<compile_context>
chip_gen: v7x
topology: tpu7x:2x2x1
jax: 0.10.0
libtpu: 0.0.40
codegen_flags: <defaults>
</compile_context>

<pallas_src>
import jax
import jax.numpy as jnp
from jax import lax
from jax.experimental import pallas as pl
from jax.experimental.pallas import tpu as pltpu


# ---------------------------------------------------------------------------
# Kernel: fused 3-layer MLP on one batch tile.
#   x_ref : (TB, IN)      batch-major tile, original dtype (usually f32)
#   w_k   : (OUT_k, IN_k) torch (out, in) layout, compute dtype (bf16 or f32)
#   b_k   : (OUT_k, 1)    f32
#   o_ref : (OUT, TB)     feature-major (lane-dense), f32
# ---------------------------------------------------------------------------
def mlp_kernel(x_ref, w1_ref, b1_ref, w2_ref, b2_ref, w3_ref, b3_ref, o_ref):
    w_dtype = w1_ref.dtype

    # layer 1: contract axis 1 of w1 with axis 1 of the batch-major x tile
    # -> feature-major (H1, TB); no transpose of x or of the weights needed.
    h = lax.dot_general(
        w1_ref[...], x_ref[...].astype(w_dtype),
        dimension_numbers=(((1,), (1,)), ((), ())),
        preferred_element_type=jnp.float32)
    h = jnp.maximum(h + b1_ref[...], 0.0)                       # (H1, TB) f32

    # layer 2: Linear + ReLU
    h = jnp.dot(w2_ref[...], h.astype(w_dtype),
                preferred_element_type=jnp.float32)
    h = jnp.maximum(h + b2_ref[...], 0.0)                       # (H2, TB) f32

    # layer 3: Linear, no activation (the `None` entry in layers_data)
    h = jnp.dot(w3_ref[...], h.astype(w_dtype),
                preferred_element_type=jnp.float32)
    o_ref[...] = (h + b3_ref[...]).astype(o_ref.dtype)          # (OUT, TB)


# ---------------------------------------------------------------------------
# One-time parameter prep (hoisted off the per-forward hot path).
# Weights keep the torch (out, in) layout; biases become (out, 1) f32.
# ---------------------------------------------------------------------------
def prepare_params(params, compute_dtype=jnp.bfloat16):
    return [(jnp.asarray(w, compute_dtype), jnp.asarray(b, jnp.float32)[:, None])
            for w, b in params]


def _round_up(n, m):
    return ((n + m - 1) // m) * m


def _resident(shape):
    # Full-array block + constant index_map -> stays in VMEM across grid steps.
    nd = len(shape)
    return pl.BlockSpec(tuple(shape), lambda *_: (0,) * nd)


# ---------------------------------------------------------------------------
# Forward: x (batch, in_features) -> (batch, out_features).  x is consumed
# batch-major straight from HBM; the kernel emits feature-major (out, batch)
# and only the tiny 8 x batch output transpose happens outside the kernel.
# ---------------------------------------------------------------------------
def net_forward(x, prepped, *, block_batch=512):
    (w1, b1), (w2, b2), (w3, b3) = prepped
    batch, in_dim = x.shape
    h1, h2, out_dim = w1.shape[0], w2.shape[0], w3.shape[0]

    # Lane-dense batch tile (multiple of 128).  Keep >= 2 grid steps once the
    # batch is big enough so the "parallel" axis can split across v7x's two
    # TensorCores; with block_batch=512 peak live vregs stay under the 64 budget.
    padded = _round_up(batch, 128)
    tb = min(block_batch, padded)
    if padded >= 256:
        tb = min(tb, _round_up(padded // 2, 128))
    grid = (pl.cdiv(batch, tb),)          # ragged edge block is clipped by Pallas

    flops = 2 * batch * (in_dim * h1 + h1 * h2 + h2 * out_dim)
    bytes_accessed = (
        x.size * x.dtype.itemsize                 # activations in (no wrapper cast/pad)
        + batch * out_dim * 4                     # feature-major f32 output
        + sum(w.size * w.dtype.itemsize + b.size * b.dtype.itemsize
              for w, b in prepped))

    out_t = pl.pallas_call(
        mlp_kernel,
        out_shape=jax.ShapeDtypeStruct((out_dim, batch), jnp.float32),
        grid=grid,
        in_specs=[
            pl.BlockSpec((tb, in_dim), lambda i: (i, 0)),   # batch-major x tile
            _resident(w1.shape), _resident(b1.shape),
            _resident(w2.shape), _resident(b2.shape),
            _resident(w3.shape), _resident(b3.shape),
        ],
        out_specs=pl.BlockSpec((out_dim, tb), lambda i: (0, i)),
        compiler_params=pltpu.CompilerParams(
            dimension_semantics=("parallel",)),             # megacore on v7x
        cost_estimate=pl.CostEstimate(
            flops=flops, transcendentals=0, bytes_accessed=bytes_accessed),
    )(x, w1, b1, w2, b2, w3, b3)

    # Feature-major inside the kernel keeps every store lane-dense; this final
    # (out_dim, batch) -> (batch, out_dim) transpose is only 8 x batch elements.
    return out_t.T


# ---------------------------------------------------------------------------
# Deterministic init mimicking torch.nn.Linear's kaiming-uniform bound.
# ---------------------------------------------------------------------------
def init_linear(key, out_features, in_features):
    kw, kb = jax.random.split(key)
    bound = 1.0 / jnp.sqrt(jnp.float32(in_features))
    w = jax.random.uniform(kw, (out_features, in_features), jnp.float32,
                           minval=-bound, maxval=bound)
    b = jax.random.uniform(kb, (out_features,), jnp.float32,
                           minval=-bound, maxval=bound)
    return w, b


if __name__ == "__main__":
    key = jax.random.PRNGKey(0)
    k_x, k1, k2, k3 = jax.random.split(key, 4)

    # Net(input_size=32, layers_data=[(64, ReLU), (64, ReLU), (8, None)])
    input_size, hidden1, hidden2, out_size = 32, 64, 64, 8

    params = [
        init_linear(k1, hidden1, input_size),
        init_linear(k2, hidden2, hidden1),
        init_linear(k3, out_size, hidden2),
    ]

    def ref_forward(xx):
        y = xx
        for li, (w, b) in enumerate(params):
            y = y @ w.T + b
            if li < len(params) - 1:
                y = jnp.maximum(y, 0.0)
        return y

    prepped_f32 = prepare_params(params, compute_dtype=jnp.float32)
    prepped_bf16 = prepare_params(params, compute_dtype=jnp.bfloat16)

    # batch=512 -> two full 256-wide tiles (exercises the parallel grid);
    # batch=200 -> ragged edge tile handled by the pl.cdiv grid (no pad copy).
    for batch in (512, 200):
        x = jax.random.normal(jax.random.fold_in(k_x, batch),
                              (batch, input_size), jnp.float32)
        ref = ref_forward(x)

        # exact-dtype path (f32 operands)
        y_f32 = jax.block_until_ready(net_forward(x, prepped_f32))
        assert y_f32.shape == (batch, out_size)
        assert jnp.allclose(y_f32, ref, atol=1e-4, rtol=1e-4)

        # default mixed-precision path (bf16 operands, f32 accumulation)
        y_bf16 = jax.block_until_ready(net_forward(x, prepped_bf16))
        assert y_bf16.shape == (batch, out_size)
        assert jnp.allclose(y_bf16, ref, atol=5e-2, rtol=5e-2)

    print("KERNEL_OK")
</pallas_src>

<mosaic_0001>
module attributes {stable_mosaic.version = 11 : i64} {
  func.func @mlp_kernel(%arg0: i32, %arg1: memref<256x32xf32, #tpu.memory_space<vmem>>, %arg2: memref<64x32xf32, #tpu.memory_space<vmem>>, %arg3: memref<64x1xf32, #tpu.memory_space<vmem>>, %arg4: memref<64x64xf32, #tpu.memory_space<vmem>>, %arg5: memref<64x1xf32, #tpu.memory_space<vmem>>, %arg6: memref<8x64xf32, #tpu.memory_space<vmem>>, %arg7: memref<8x1xf32, #tpu.memory_space<vmem>>, %arg8: memref<8x256xf32, #tpu.memory_space<vmem>>) attributes {dimension_semantics = [#tpu.dimension_semantics<parallel>], iteration_bounds = array<i64: 2>, scalar_prefetch = 0 : i64, scratch_operands = 0 : i64, tpu.core_type = #tpu.core_type<tc>, window_params = [{transform_indices = @transform_0, window_bounds = array<i64: 256, 32>}, {pipeline_mode = #tpu.pipeline_mode<synchronous>, transform_indices = @transform_1, window_bounds = array<i64: 64, 32>}, {pipeline_mode = #tpu.pipeline_mode<synchronous>, transform_indices = @transform_2, window_bounds = array<i64: 64, 1>}, {pipeline_mode = #tpu.pipeline_mode<synchronous>, transform_indices = @transform_3, window_bounds = array<i64: 64, 64>}, {pipeline_mode = #tpu.pipeline_mode<synchronous>, transform_indices = @transform_4, window_bounds = array<i64: 64, 1>}, {pipeline_mode = #tpu.pipeline_mode<synchronous>, transform_indices = @transform_5, window_bounds = array<i64: 8, 64>}, {pipeline_mode = #tpu.pipeline_mode<synchronous>, transform_indices = @transform_6, window_bounds = array<i64: 8, 1>}, {transform_indices = @transform_7, window_bounds = array<i64: 8, 256>}]} {
    %c0 = arith.constant 0 : index
    %c0_0 = arith.constant 0 : index
    %0 = vector.load %arg2[%c0, %c0_0] : memref<64x32xf32, #tpu.memory_space<vmem>>, vector<64x32xf32>
    %c0_1 = arith.constant 0 : index
    %c0_2 = arith.constant 0 : index
    %1 = vector.load %arg1[%c0_1, %c0_2] : memref<256x32xf32, #tpu.memory_space<vmem>>, vector<256x32xf32>
    %cst = arith.constant dense<0.000000e+00> : vector<64x256xf32>
    %2 = tpu.matmul %0, %1, %cst {dimension_numbers = #tpu.dot_dimension_numbers<[1], [1], [0], [0], [0, 0, 1, 0], [], []>} : vector<64x32xf32>, vector<256x32xf32>, vector<64x256xf32> -> vector<64x256xf32>
    %c0_3 = arith.constant 0 : index
    %c0_4 = arith.constant 0 : index
    %3 = vector.load %arg3[%c0_3, %c0_4] : memref<64x1xf32, #tpu.memory_space<vmem>>, vector<64x1xf32>
    %4 = vector.broadcast %3 : vector<64x1xf32> to vector<64x256xf32>
    %5 = arith.addf %2, %4 : vector<64x256xf32>
    %cst_5 = arith.constant 0.000000e+00 : f32
    %6 = vector.broadcast %cst_5 : f32 to vector<64x256xf32>
    %7 = arith.maximumf %5, %6 : vector<64x256xf32>
    %c0_6 = arith.constant 0 : index
    %c0_7 = arith.constant 0 : index
    %8 = vector.load %arg4[%c0_6, %c0_7] : memref<64x64xf32, #tpu.memory_space<vmem>>, vector<64x64xf32>
    %cst_8 = arith.constant dense<0.000000e+00> : vector<64x256xf32>
    %9 = tpu.matmul %8, %7, %cst_8 {dimension_numbers = #tpu.dot_dimension_numbers<[1], [0], [0], [1], [0, 0, 1, 1], [], []>} : vector<64x64xf32>, vector<64x256xf32>, vector<64x256xf32> -> vector<64x256xf32>
    %c0_9 = arith.constant 0 : index
    %c0_10 = arith.constant 0 : index
    %10 = vector.load %arg5[%c0_9, %c0_10] : memref<64x1xf32, #tpu.memory_space<vmem>>, vector<64x1xf32>
    %11 = vector.broadcast %10 : vector<64x1xf32> to vector<64x256xf32>
    %12 = arith.addf %9, %11 : vector<64x256xf32>
    %cst_11 = arith.constant 0.000000e+00 : f32
    %13 = vector.broadcast %cst_11 : f32 to vector<64x256xf32>
    %14 = arith.maximumf %12, %13 : vector<64x256xf32>
    %c0_12 = arith.constant 0 : index
    %c0_13 = arith.constant 0 : index
    %15 = vector.load %arg6[%c0_12, %c0_13] : memref<8x64xf32, #tpu.memory_space<vmem>>, vector<8x64xf32>
    %cst_14 = arith.constant dense<0.000000e+00> : vector<8x256xf32>
    %16 = tpu.matmul %15, %14, %cst_14 {dimension_numbers = #tpu.dot_dimension_numbers<[1], [0], [0], [1], [0, 0, 1, 1], [], []>} : vector<8x64xf32>, vector<64x256xf32>, vector<8x256xf32> -> vector<8x256xf32>
    %c0_15 = arith.constant 0 : index
    %c0_16 = arith.constant 0 : index
    %17 = vector.load %arg7[%c0_15, %c0_16] : memref<8x1xf32, #tpu.memory_space<vmem>>, vector<8x1xf32>
    %18 = vector.broadcast %17 : vector<8x1xf32> to vector<8x256xf32>
    %19 = arith.addf %16, %18 : vector<8x256xf32>
    %c0_17 = arith.constant 0 : index
    %c0_18 = arith.constant 0 : index
    %20 = vector.load %arg8[%c0_17, %c0_18] : memref<8x256xf32, #tpu.memory_space<vmem>>, vector<8x256xf32>
    tpu.vector_store %arg8[%c0_17, %c0_18], %19 {strides = array<i32>} : memref<8x256xf32, #tpu.memory_space<vmem>>, vector<8x256xf32>,
    return
  }
  func.func @transform_0(%arg0: i32) -> (i32, i32) {
    %c0_i32 = arith.constant 0 : i32
    %c0_i32_0 = arith.constant 0 : i32
    return %arg0, %c0_i32 : i32, i32
  }
  func.func @transform_1(%arg0: i32) -> (i32, i32) {
    %c0_i32 = arith.constant 0 : i32
    %c0_i32_0 = arith.constant 0 : i32
    %c0_i32_1 = arith.constant 0 : i32
    return %c0_i32, %c0_i32_0 : i32, i32
  }
  func.func @transform_2(%arg0: i32) -> (i32, i32) {
    %c0_i32 = arith.constant 0 : i32
    %c0_i32_0 = arith.constant 0 : i32
    %c0_i32_1 = arith.constant 0 : i32
    return %c0_i32, %c0_i32_0 : i32, i32
  }
  func.func @transform_3(%arg0: i32) -> (i32, i32) {
    %c0_i32 = arith.constant 0 : i32
    %c0_i32_0 = arith.constant 0 : i32
    %c0_i32_1 = arith.constant 0 : i32
    return %c0_i32, %c0_i32_0 : i32, i32
  }
  func.func @transform_4(%arg0: i32) -> (i32, i32) {
    %c0_i32 = arith.constant 0 : i32
    %c0_i32_0 = arith.constant 0 : i32
    %c0_i32_1 = arith.constant 0 : i32
    return %c0_i32, %c0_i32_0 : i32, i32
  }
  func.func @transform_5(%arg0: i32) -> (i32, i32) {
    %c0_i32 = arith.constant 0 : i32
    %c0_i32_0 = arith.constant 0 : i32
    %c0_i32_1 = arith.constant 0 : i32
    return %c0_i32, %c0_i32_0 : i32, i32
  }
  func.func @transform_6(%arg0: i32) -> (i32, i32) {
    %c0_i32 = arith.constant 0 : i32
    %c0_i32_0 = arith.constant 0 : i32
    %c0_i32_1 = arith.constant 0 : i32
    return %c0_i32, %c0_i32_0 : i32, i32
  }
  func.func @transform_7(%arg0: i32) -> (i32, i32) {
    %c0_i32 = arith.constant 0 : i32
    %c0_i32_0 = arith.constant 0 : i32
    return %c0_i32, %arg0 : i32, i32
  }
}

</mosaic_0001>

<bundles_post_ra>
// kernel: tpu_custom_call.1
= control target key start
LH: loop header
LB: loop body
LE: loop exit
PB: predicated region body
PF: predicated region fallthrough
CT: control target
= control target key end

     0   :  { %12 = vsyncpa [#allocation3], 0  ;;  %s1636_s0 = inlined_call_operand.vmem [shape: f32[512,32], index: 0, kind: input, shape index: {}]   ;;  %s1637_s1 = inlined_call_operand.vmem [shape: f32[64,32], index: 1, kind: input, shape index: {}]   ;;  %s1638_s2 = inlined_call_operand.vmem [shape: f32[64,1], index: 2, kind: input, shape index: {}]   ;;  %s1639_s3 = inlined_call_operand.vmem [shape: f32[64,64], index: 3, kind: input, shape index: {}]   ;;  %s1640_s4 = inlined_call_operand.vmem [shape: f32[64,1], index: 4, kind: input, shape index: {}]   ;;  %s1641_s5 = inlined_call_operand.vmem [shape: f32[8,64], index: 5, kind: input, shape index: {}]   ;;  %s1642_s6 = inlined_call_operand.vmem [shape: f32[8,1], index: 6, kind: input, shape index: {}]   ;;  %s1643_s7 = inlined_call_operand.hbm [shape: f32[8,512], index: 7, kind: output, shape index: {}]  }
   0x1   :  { %14 = vsyncpa [#allocation3 + $0x1], 0  ;;  %s1325_s24 = smov 0   ;;  %s1327_s25 = smov 0  }
   0x2   :  { %s1329_s26 = smov 0   ;;  %s1331_s27 = smov 0  }
   0x3 LB: > { %s1346_s28 = sadd.s32 4294967295, %s1280_s27   ;;  %s985_s29 = sadd.s32 4294967294, %s1280_s27   ;;  %s1280_s27 = sphi %s1331_s27, %s1651_s27   ;;  %s1276_s26 = sphi %s1329_s26, %s1650_s26   ;;  %s1272_s25 = sphi %s1327_s25, %s1649_s25   ;;  %s1268_s24 = sphi %s1325_s24, %s1648_s24  }
   0x4   : > { %s1350_s30 = sadd.s32 1, %s1280_s27   ;;  %s179_s8 = sadd.s32 1, %s1276_s26 }
   0x5   : > { %s176_s9 = ssub.s32 %s1280_s27, %s1350_s30  ;;  %p189_p0 = scmp.ne.s32.totalorder %s1276_s26, %s1272_s25 }
   0x6   : > { %p177_p1 = scmp.eq.s32.totalorder %s176_s9, 0  ;;  %p190_p2 = scmp.eq.s32.totalorder %s1346_s28, 1 }
   0x7   : > { %p195_p3 = scmp.ne.s32.totalorder %s1272_s25, %s1268_s24  ;;  %p196_p4 = scmp.eq.s32.totalorder %s985_s29, 1 }
   0x8   : > { %s1361_s10 = scalar_select %p177_p1, %s1276_s26, %s179_s8  }
   0x9   : > { %p1363_p5 = por %p190_p2, %p189_p0  ;;  %p1367_p6 = por %p196_p4, %p195_p3 }
   0xa   : > { %p988_p7 = scmp.ge.s32.totalorder %s1280_s27, 1  ;;  %p241_p8 = scmp.lt.s32.totalorder %s1280_s27, 3 }
   0xc   : > { %p242_p9 = pnand %p988_p7, %p241_p8 }
   0xd   : > { %s990_s13 = sshll.u32 (!%p242_p9), %s1346_s28, 5  ;;  %vm368_vm0 = vcmask (!%p242_p9), 261120   ;;  %v1377_v0 = vld [vmem:[%s1637_s1] sm:$0xff] (!%p242_p9)  ;;  %v1282_v1 = vmov (!%p242_p9), 0   ;;  %v322_v3 = vld [vmem:[%s1638_s2 + $0x10] sm:$0xff] (!%p242_p9)  ;;  %v321_v4 = vld [vmem:[%s1638_s2 + $0x8] sm:$0xff] (!%p242_p9) }
   0xe   : > { %245 = sbr.rel (%p242_p9) target bundleno = 822 (0x336), region = 48  ;;  %p274_p10 = scmp.lt.s32.totalorder (!%p242_p9), %s990_s13, 63  ;;  %1079 = vmatprep.mubr.msk.f32.mxu0 (!%p242_p9), %vm368_vm0, %v1377_v0  ;;  %1216 = vset.pattern.permute.xlu0 (!%p242_p9), %v1282_v1  ;;  %v320_v2 = vld [vmem:[%s1638_s2] sm:$0xff] (!%p242_p9)  ;;  %v323_v5 = vld [vmem:[%s1638_s2 + $0x18] sm:$0xff] (!%p242_p9)  ;;  %vm1400_vm1 = vmpackc.low (!%p242_p9), %vm368_vm0, %vm368_vm0  ;;  %vm674_vm2 = vcmask (!%p242_p9), 523264  }
   0xf   : > { %1217 = vset.pattern.permute.xlu1 (!%p242_p9), %v1282_v1  ;;  %330 = vperm.xlu0 (!%p242_p9), %1216, %v320_v2   ;;  %v324_v16 = vld [vmem:[%s1638_s2 + $0x20] sm:$0xff] (!%p242_p9)  ;;  %v325_v17 = vld [vmem:[%s1638_s2 + $0x28] sm:$0xff] (!%p242_p9)  ;;  %v326_v22 = vld [vmem:[%s1638_s2 + $0x30] sm:$0xff] (!%p242_p9)  ;;  %s1046_s19 = sshll.u32 (!%p242_p9), %s1346_s28, 8  ;;  %s1284_s9 = smov (!%p242_p9), [#allocation2]  }
  0x10   : > { %340 = vperm.xlu1 (!%p242_p9), %1217, %v322_v3   ;;  %v327_v23 = vld [vmem:[%s1638_s2 + $0x38] sm:$0xff] (!%p242_p9)  ;;  %v626_v26 = vld [vmem:[%s1640_s4] sm:$0xff] (!%p242_p9)  ;;  %v627_v27 = vld [vmem:[%s1640_s4 + $0x8] sm:$0xff] (!%p242_p9)  ;;  %s1594_s29 = scalar_lea.hbm (!%p242_p9), %s1643_s7, %s1046_s19 }
  0x11   : > { %v628_v32 = vld [vmem:[%s1640_s4 + $0x10] sm:$0xff] (!%p242_p9)  ;;  %v629_v33 = vld [vmem:[%s1640_s4 + $0x18] sm:$0xff] (!%p242_p9)  ;;  %v630_v36 = vld [vmem:[%s1640_s4 + $0x20] sm:$0xff] (!%p242_p9) }
  0x12   : > { %v631_v37 = vld [vmem:[%s1640_s4 + $0x28] sm:$0xff] (!%p242_p9)  ;;  %v632_v42 = vld [vmem:[%s1640_s4 + $0x30] sm:$0xff] (!%p242_p9)  ;;  %v633_v43 = vld [vmem:[%s1640_s4 + $0x38] sm:$0xff] (!%p242_p9) }
  0x13   : > { %335 = vperm.xlu0 (!%p242_p9), %1216, %v321_v4   ;;  %v829_v46 = vld [vmem:[%s1642_s6] sm:$0xff] (!%p242_p9)  ;;  %v283_v6 = vld [vmem:[%s1637_s1 + $0x18] sm:$0xff] (!%p242_p9) }
  0x14   : > { %345 = vperm.xlu1 (!%p242_p9), %1217, %v323_v5   ;;  %v281_v5 = vld [vmem:[%s1637_s1 + $0x8] sm:$0xff] (!%p242_p9) }
  0x15   : > { %s1653_s13 = smov (!%p274_p10, %s990_s13), 63 }
  0x16   : > { %s991_s20 = sshll.u32 %s1653_s13, 3  ;;  %s1222_s13 = sshll.u32 %s1284_s9, 4  ;;  %s1223_s13 = int_to_ptr.vmem [resolvable:$false] %s1222_s13 }
  0x17   : > { %s1396_s14 = scalar_lea.vmem %s1636_s0, %s991_s20  ;;  %350 = vperm.xlu0 %1216, %v324_v16   ;;  %s1224_s15 = scalar_lea.vmem %s1223_s13, 512 }
  0x18   : > { %v304_v7 = vld [vmem:[%s1396_s14 + $0x80] sm:$0xff]  ;;  %v305_v8 = vld [vmem:[%s1396_s14 + $0x88] sm:$0xff]  ;;  %v306_v12 = vld [vmem:[%s1396_s14 + $0x90] sm:$0xff]  ;;  %355 = vperm.xlu1 %1217, %v325_v17  }
  0x19   : > { %v288_v9 = vld [vmem:[%s1396_s14] sm:$0xff]  ;;  %v1095_v10 = vpack.c.bf16 %v305_v8, %v304_v7  ;;  %v289_v11 = vld [vmem:[%s1396_s14 + $0x8] sm:$0xff]  ;;  %v307_v13 = vld [vmem:[%s1396_s14 + $0x98] sm:$0xff] }
  0x1a   : > { %v1098_v14 = vpack.c.bf16 %v289_v11, %v288_v9  ;;  %v1101_v15 = vpack.c.bf16 %v307_v13, %v306_v12  ;;  %v290_v18 = vld [vmem:[%s1396_s14 + $0x10] sm:$0xff]  ;;  %v291_v19 = vld [vmem:[%s1396_s14 + $0x18] sm:$0xff]  ;;  %v308_v20 = vld [vmem:[%s1396_s14 + $0xa0] sm:$0xff]  ;;  %v1283_v11 = vmov 0.0  }
  0x1b   : > { %1097 = vmatprep.subr.msk.bf16.mxu0 %vm1400_vm1, %v1095_v10  ;;  %v309_v21 = vld [vmem:[%s1396_s14 + $0xa8] sm:$0xff]  ;;  %v1104_v24 = vpack.c.bf16 %v291_v19, %v290_v18  ;;  %360 = vperm.xlu0 %1216, %v326_v22   ;;  %v292_v28 = vld [vmem:[%s1396_s14 + $0x20] sm:$0xff]  ;;  %v310_v30 = vld [vmem:[%s1396_s14 + $0xb0] sm:$0xff] }
  0x1c   : > { %1100 = vmatpush3.bf16.xpose.msk.msra.mxu0 %vm1400_vm1, %v1098_v14  ;;  %v1107_v25 = vpack.c.bf16 %v309_v21, %v308_v20  ;;  %365 = vperm.xlu1 %1217, %v327_v23   ;;  %v293_v29 = vld [vmem:[%s1396_s14 + $0x28] sm:$0xff]  ;;  %v311_v31 = vld [vmem:[%s1396_s14 + $0xb8] sm:$0xff]  ;;  %v294_v38 = vld [vmem:[%s1396_s14 + $0x30] sm:$0xff] }
  0x1d   : > { %1103 = vmatprep.subr.msk.bf16.mxu0 %vm1400_vm1, %v1101_v15  ;;  %v1110_v34 = vpack.c.bf16 %v293_v29, %v292_v28  ;;  %v1113_v35 = vpack.c.bf16 %v311_v31, %v310_v30  ;;  %v295_v39 = vld [vmem:[%s1396_s14 + $0x38] sm:$0xff]  ;;  %v312_v40 = vld [vmem:[%s1396_s14 + $0xc0] sm:$0xff]  ;;  %v313_v41 = vld [vmem:[%s1396_s14 + $0xc8] sm:$0xff]  ;;  %763 = vmatprep.mubr.f32.mxu1 %v1283_v11 }
  0x1e   : > { %v1116_v44 = vpack.c.bf16 %v295_v39, %v294_v38  ;;  %v1119_v45 = vpack.c.bf16 %v313_v41, %v312_v40  ;;  %v296_v47 = vld [vmem:[%s1396_s14 + $0x40] sm:$0xff]  ;;  %v297_v48 = vld [vmem:[%s1396_s14 + $0x48] sm:$0xff]  ;;  %v314_v49 = vld [vmem:[%s1396_s14 + $0xd0] sm:$0xff] }
  0x1f   : > { %636 = vperm.xlu0 %1216, %v626_v26   ;;  %v315_v50 = vld [vmem:[%s1396_s14 + $0xd8] sm:$0xff]  ;;  %v1122_v51 = vpack.c.bf16 %v297_v48, %v296_v47  ;;  %v298_v53 = vld [vmem:[%s1396_s14 + $0x50] sm:$0xff]  ;;  %v316_v55 = vld [vmem:[%s1396_s14 + $0xe0] sm:$0xff] }
  0x20   : > { %641 = vperm.xlu1 %1217, %v627_v27   ;;  %v1125_v52 = vpack.c.bf16 %v315_v50, %v314_v49  ;;  %v299_v54 = vld [vmem:[%s1396_s14 + $0x58] sm:$0xff]  ;;  %v317_v56 = vld [vmem:[%s1396_s14 + $0xe8] sm:$0xff]  ;;  %v300_v59 = vld [vmem:[%s1396_s14 + $0x60] sm:$0xff] }
  0x21   : > { %v1128_v57 = vpack.c.bf16 %v299_v54, %v298_v53  ;;  %v1131_v58 = vpack.c.bf16 %v317_v56, %v316_v55  ;;  %v301_v60 = vld [vmem:[%s1396_s14 + $0x68] sm:$0xff]  ;;  %v318_v61 = vld [vmem:[%s1396_s14 + $0xf0] sm:$0xff]  ;;  %v319_v62 = vld [vmem:[%s1396_s14 + $0xf8] sm:$0xff] }
  0x22   : > { %v1134_v63 = vpack.c.bf16 %v301_v60, %v300_v59  ;;  %v1137_v1 = vpack.c.bf16 %v319_v62, %v318_v61  ;;  %v302_v2 = vld [vmem:[%s1396_s14 + $0x70] sm:$0xff]  ;;  %v303_v3 = vld [vmem:[%s1396_s14 + $0x78] sm:$0xff]  ;;  %v285_v8 = vld [vmem:[%s1637_s1 + $0x28] sm:$0xff]  ;;  %s270_s14 = sand.u32 1, %s1272_s25  }
  0x23   : > { %646 = vperm.xlu0 %1216, %v628_v32   ;;  %v1140_v4 = vpack.c.bf16 %v303_v3, %v302_v2  ;;  %v282_v7 = vld [vmem:[%s1637_s1 + $0x10] sm:$0xff]  ;;  %v287_v10 = vld [vmem:[%s1637_s1 + $0x38] sm:$0xff]  ;;  %s989_s18 = sshll.u32 %s270_s14, 4  ;;  %s912_s28 = scalar_lea.sflag [#allocation3], %s270_s14 }
  0x24   : > { %1106 = vmatpush3.bf16.xpose.msk.msra.mxu0 %vm1400_vm1, %v1104_v24  ;;  %651 = vperm.xlu1 %1217, %v629_v33   ;;  %v286_v9 = vld [vmem:[%s1637_s1 + $0x30] sm:$0xff]  ;;  %s272_s20 = scalar_lea.vmem [#allocation2], %s989_s18 }
  0x25   : > { %1109 = vmatprep.subr.msk.bf16.mxu0 %vm1400_vm1, %v1107_v25  ;;  %s926_s21 = sshll.u32 %s272_s20, 4  ;;  %s1596_s21 = int_to_ptr.vmem [resolvable:$true] %s926_s21 }
  0x26   : > { %s1218_s8 = scalar_lea.vmem %s1596_s21, 256  ;;  %p1225_p0 = scmp.lt.s32.totalorder %s1596_s21, %s1223_s13 }
  0x27   : > { %656 = vperm.xlu0 %1216, %v630_v36   ;;  %p1219_p11 = scmp.ne.s32.totalorder %s1596_s21, %s1218_s8  ;;  %p1226_p1 = scmp.lt.s32.totalorder %s1224_s15, %s1218_s8 }
  0x28   : > { %661 = vperm.xlu1 %1217, %v631_v37  }
  0x29   : > { %p1220_p12 = pnand %p1219_p11, %p1363_p5  ;;  %p1227_p2 = por %p1226_p1, %p1225_p0 }
  0x2b   : > { %666 = vperm.xlu0 %1216, %v632_v42   ;;  %p1221_p13 = pneg %p1220_p12 }
  0x2c   : > { %1112 = vmatpush3.bf16.xpose.msk.msra.mxu0 %vm1400_vm1, %v1110_v34  ;;  %671 = vperm.xlu1 %1217, %v633_v43  }
  0x2d   : > { %1115 = vmatprep.subr.msk.bf16.mxu0 %vm1400_vm1, %v1113_v35  ;;  %p1228_p3 = pnand %p1227_p2, %p1221_p13 }
  0x2f   : > { %832 = vperm.xlu0 %1216, %v829_v46  }
  0x34   : > { %1118 = vmatpush3.bf16.xpose.msk.msra.mxu0 %vm1400_vm1, %v1116_v44 }
  0x35   : > { %1121 = vmatprep.subr.msk.bf16.mxu0 %vm1400_vm1, %v1119_v45 }
  0x3c   : > { %1124 = vmatpush3.bf16.xpose.msk.msra.mxu0 %vm1400_vm1, %v1122_v51 }
  0x3d   : > { %1127 = vmatprep.subr.msk.bf16.mxu0 %vm1400_vm1, %v1125_v52 }
  0x44   : > { %1130 = vmatpush3.bf16.xpose.msk.msra.mxu0 %vm1400_vm1, %v1128_v57 }
  0x45   : > { %1133 = vmatprep.subr.msk.bf16.mxu0 %vm1400_vm1, %v1131_v58 }
  0x4c   : > { %1136 = vmatpush3.bf16.xpose.msk.msra.mxu0 %vm1400_vm1, %v1134_v63 }
  0x4d   : > { %1139 = vmatprep.subr.msk.bf16.mxu0 %vm1400_vm1, %v1137_v1 }
  0x54   : > { %1142 = vmatpush3.bf16.xpose.msk.msra.mxu0 %vm1400_vm1, %v1140_v4 }
  0x5b   : > { %1080 = vmatmul.mubr.msk.f32.vlgmr.msra.gmra.mrb[0].mxu0 %vm368_vm0, %v1377_v0  ;;  %v284_v0 = vld [vmem:[%s1637_s1 + $0x20] sm:$0xff] }
  0x5c   : > { %1081 = vmatprep.mubr.msk.f32.mxu0 %vm368_vm0, %v281_v5 }
  0x5f   : > { %1082 = vmatmul.mubr.msk.f32.gmra.mrb[2].mxu0 %vm368_vm0, %v281_v5 }
  0x60   : > { %1083 = vmatprep.mubr.msk.f32.mxu0 %vm368_vm0, %v282_v7 }
  0x63   : > { %1084 = vmatmul.mubr.msk.f32.gmra.mrb[4].mxu0 %vm368_vm0, %v282_v7 }
  0x64   : > { %1085 = vmatprep.mubr.msk.f32.mxu0 %vm368_vm0, %v283_v6 }
  0x67   : > { %1086 = vmatmul.mubr.msk.f32.gmra.mrb[6].mxu0 %vm368_vm0, %v283_v6 }
  0x68   : > { %1087 = vmatprep.mubr.msk.f32.mxu0 %vm368_vm0, %v284_v0 }
  0x6b   : > { %1088 = vmatmul.mubr.msk.f32.gmra.mrb[8].mxu0 %vm368_vm0, %v284_v0 }
  0x6c   : > { %1089 = vmatprep.mubr.msk.f32.mxu0 %vm368_vm0, %v285_v8 }
  0x6f   : > { %1090 = vmatmul.mubr.msk.f32.gmra.mrb[10].mxu0 %vm368_vm0, %v285_v8 }
  0x70   : > { %1091 = vmatprep.mubr.msk.f32.mxu0 %vm368_vm0, %v286_v9 }
  0x73   : > { %1092 = vmatmul.mubr.msk.f32.gmra.mrb[12].mxu0 %vm368_vm0, %v286_v9 }
  0x74   : > { %1093 = vmatprep.mubr.msk.f32.mxu0 %vm368_vm0, %v287_v10 }
  0x77   : > { %1094 = vmatmul.mubr.msk.f32.gmra.mrb[14].mxu0 %vm368_vm0, %v287_v10 }
  0x8e   : > { %v331_v12 = vpop.permute.xlu0 %330 }
  0x8f   : > { %v341_v21 = vpop.permute.xlu1 %340 }
  0x92   : > { %v336_v16 = vpop.permute.xlu0 %335 }
  0x93   : > { %v346_v32 = vpop.permute.xlu1 %345 }
  0x96   : > { %v351_v45 = vpop.permute.xlu0 %350 }
  0x97   : > { %v356_v48 = vpop.permute.xlu1 %355 }
  0x9a   : > { %v361_v61 = vpop.permute.xlu0 %360 }
  0x9b   : > { %v366_v1 = vpop.permute.xlu1 %365 }
 0x12e   : > { %v555_v13 = vpop.f32.mrb[0].mxu0 }
 0x12f   : > { %v557_v14 = vpop.f32.mrb[1].mxu0  ;;  %v556_v15 = vadd.f32 %v555_v13, %v331_v12  ;;  %v618_v13 = vld [vmem:[%s1639_s3] sm:$0xff] }
 0x130   : > { %v558_v17 = vadd.f32 %v557_v14, %v331_v12  ;;  %v619_v14 = vld [vmem:[%s1639_s3 + $0x8] sm:$0xff] }
 0x131   : > { %v602_v23 = vmax.f32 %v556_v15, 0.0  ;;  %v620_v15 = vld [vmem:[%s1639_s3 + $0x10] sm:$0xff] }
 0x132   : > { %v561_v18 = vpop.f32.mrb[2].mxu0  ;;  %v603_v25 = vmax.f32 %v558_v17, 0.0  ;;  %v622_v17 = vld [vmem:[%s1639_s3 + $0x20] sm:$0xff] }
 0x133   : > { %v562_v19 = vadd.f32 %v561_v18, %v336_v16  ;;  %v563_v20 = vpop.f32.mrb[3].mxu0  ;;  %v623_v18 = vld [vmem:[%s1639_s3 + $0x28] sm:$0xff] }
 0x134   : > { %v564_v22 = vadd.f32 %v563_v20, %v336_v16  ;;  %v621_v16 = vld [vmem:[%s1639_s3 + $0x18] sm:$0xff] }
 0x135   : > { %v604_v24 = vmax.f32 %v562_v19, 0.0  ;;  %v624_v19 = vld [vmem:[%s1639_s3 + $0x30] sm:$0xff]  ;;  %v625_v20 = vld [vmem:[%s1639_s3 + $0x38] sm:$0xff] }
 0x136   : > { %v605_v26 = vmax.f32 %v564_v22, 0.0  ;;  %v567_v27 = vpop.f32.mrb[4].mxu0 }
 0x137   : > { %v569_v28 = vpop.f32.mrb[5].mxu0  ;;  %v1145_v29 = vpack.c.bf16 %v604_v24, %v602_v23  ;;  %v568_v31 = vadd.f32 %v567_v27, %v341_v21  ;;  %v637_v23 = vpop.permute.xlu0 %636 }
 0x138   : > { %v1143_v30 = vpack.c.bf16 %v605_v26, %v603_v25  ;;  %v570_v33 = vadd.f32 %v569_v28, %v341_v21  ;;  %v642_v25 = vpop.permute.xlu1 %641 }
 0x139   : > { %v606_v38 = vmax.f32 %v568_v31, 0.0 }
 0x13a   : > { %v573_v34 = vpop.f32.mrb[6].mxu0  ;;  %1144 = vmatprep.subr.bf16.mxu1 %v1143_v30  ;;  %v607_v40 = vmax.f32 %v570_v33, 0.0 }
 0x13b   : > { %v574_v35 = vadd.f32 %v573_v34, %v346_v32  ;;  %v575_v36 = vpop.f32.mrb[7].mxu0  ;;  %1146 = vmatpush1.bf16.msra.mxu1 %v1145_v29 }
 0x13c   : > { %v576_v37 = vadd.f32 %v575_v36, %v346_v32 }
 0x13d   : > { %v608_v39 = vmax.f32 %v574_v35, 0.0 }
 0x13e   : > { %v609_v41 = vmax.f32 %v576_v37, 0.0  ;;  %v579_v42 = vpop.f32.mrb[8].mxu0 }
 0x13f   : > { %v1149_v43 = vpack.c.bf16 %v608_v39, %v606_v38  ;;  %v581_v44 = vpop.f32.mrb[9].mxu0  ;;  %v580_v47 = vadd.f32 %v579_v42, %v351_v45  ;;  %v647_v38 = vpop.permute.xlu0 %646 }
 0x140   : > { %v1147_v46 = vpack.c.bf16 %v609_v41, %v607_v40  ;;  %v582_v49 = vadd.f32 %v581_v44, %v351_v45  ;;  %v652_v40 = vpop.permute.xlu1 %651 }
 0x141   : > { %v610_v54 = vmax.f32 %v580_v47, 0.0 }
 0x142   : > { %v585_v50 = vpop.f32.mrb[10].mxu0  ;;  %1148 = vmatprep.subr.bf16.mxu1 %v1147_v46  ;;  %v611_v56 = vmax.f32 %v582_v49, 0.0 }
 0x143   : > { %v586_v51 = vadd.f32 %v585_v50, %v356_v48  ;;  %v587_v52 = vpop.f32.mrb[11].mxu0  ;;  %1150 = vmatpush1.bf16.msra.mxu1 %v1149_v43 }
 0x144   : > { %v588_v53 = vadd.f32 %v587_v52, %v356_v48 }
 0x145   : > { %v612_v55 = vmax.f32 %v586_v51, 0.0 }
 0x146   : > { %v613_v57 = vmax.f32 %v588_v53, 0.0  ;;  %v591_v58 = vpop.f32.mrb[12].mxu0  ;;  %v657_v53 = vpop.permute.xlu0 %656 }
 0x147   : > { %v1153_v59 = vpack.c.bf16 %v612_v55, %v610_v54  ;;  %v593_v60 = vpop.f32.mrb[13].mxu0  ;;  %v592_v63 = vadd.f32 %v591_v58, %v361_v61 }
 0x148   : > { %v1151_v62 = vpack.c.bf16 %v613_v57, %v611_v56  ;;  %v594_v2 = vadd.f32 %v593_v60, %v361_v61  ;;  %v662_v56 = vpop.permute.xlu1 %661 }
 0x149   : > { %v614_v6 = vmax.f32 %v592_v63, 0.0 }
 0x14a   : > { %v597_v3 = vpop.f32.mrb[14].mxu0  ;;  %1152 = vmatprep.subr.bf16.mxu1 %v1151_v62  ;;  %v615_v8 = vmax.f32 %v594_v2, 0.0 }
 0x14b   : > { %v598_v4 = vadd.f32 %v597_v3, %v366_v1  ;;  %v599_v5 = vpop.f32.mrb[15].mxu0  ;;  %1154 = vmatpush1.bf16.msra.mxu1 %v1153_v59 }
 0x14c   : > { %v600_v7 = vadd.f32 %v599_v5, %v366_v1 }
 0x14d   : > { %v616_v0 = vmax.f32 %v598_v4, 0.0 }
 0x14e   : > { %v617_v9 = vmax.f32 %v600_v7, 0.0  ;;  %v667_v7 = vpop.permute.xlu0 %666 }
 0x14f   : > { %v1157_v10 = vpack.c.bf16 %v616_v0, %v614_v6 }
 0x150   : > { %v1155_v12 = vpack.c.bf16 %v617_v9, %v615_v8  ;;  %v672_v8 = vpop.permute.xlu1 %671 }
 0x152   : > { %1156 = vmatprep.subr.bf16.mxu1 %v1155_v12 }
 0x153   : > { %1158 = vmatpush1.bf16.msra.mxu1 %v1157_v10 }
 0x156   : > { %1032 = vmatmul.mubr.msk.f32.vlgmr.msra.gmra.mrb[0].mxu1 %vm674_vm2, %v618_v13 }
 0x157   : > { %769 = vmatprep.mubr.f32.mxu1 %v1283_v11 }
 0x15a   : > { %1033 = vmatmul.mubr.msk.f32.gmra.mrb[2].mxu1 %vm674_vm2, %v619_v14 }
 0x15b   : > { %775 = vmatprep.mubr.f32.mxu1 %v1283_v11 }
 0x15e   : > { %1034 = vmatmul.mubr.msk.f32.gmra.mrb[4].mxu1 %vm674_vm2, %v620_v15 }
 0x15f   : > { %781 = vmatprep.mubr.f32.mxu1 %v1283_v11 }
 0x162   : > { %1035 = vmatmul.mubr.msk.f32.gmra.mrb[6].mxu1 %vm674_vm2, %v621_v16 }
 0x163   : > { %787 = vmatprep.mubr.f32.mxu1 %v1283_v11 }
 0x166   : > { %1036 = vmatmul.mubr.msk.f32.gmra.mrb[8].mxu1 %vm674_vm2, %v622_v17 }
 0x167   : > { %793 = vmatprep.mubr.f32.mxu1 %v1283_v11 }
 0x16a   : > { %1037 = vmatmul.mubr.msk.f32.gmra.mrb[10].mxu1 %vm674_vm2, %v623_v18 }
 0x16b   : > { %799 = vmatprep.mubr.f32.mxu1 %v1283_v11 }
 0x16e   : > { %1038 = vmatmul.mubr.msk.f32.gmra.mrb[12].mxu1 %vm674_vm2, %v624_v19 }
 0x16f   : > { %805 = vmatprep.mubr.f32.mxu1 %v1283_v11 }
 0x172   : > { %1039 = vmatmul.mubr.msk.f32.gmra.mrb[14].mxu1 %vm674_vm2, %v625_v20 }
 0x173   : > { %902 = vmatprep.mubr.f32.mxu1 %v1283_v11 }
 0x229   : > { %v765_v21 = vpop.f32.mrb[0].mxu1 }
 0x22a   : > { %v767_v22 = vpop.f32.mrb[1].mxu1  ;;  %v766_v24 = vadd.f32 %v765_v21, %v637_v23  ;;  %v828_v21 = vld [vmem:[%s1641_s5] sm:$0xff] }
 0x22b   : > { %v768_v26 = vadd.f32 %v767_v22, %v637_v23  ;;  %v833_v22 = vpop.permute.xlu0 %832 }
 0x22c   : > { %v812_v31 = vmax.f32 %v766_v24, 0.0 }
 0x22d   : > { %v771_v27 = vpop.f32.mrb[2].mxu1  ;;  %v813_v33 = vmax.f32 %v768_v26, 0.0 }
 0x22e   : > { %v772_v28 = vadd.f32 %v771_v27, %v642_v25  ;;  %v773_v29 = vpop.f32.mrb[3].mxu1 }
 0x22f   : > { %v774_v30 = vadd.f32 %v773_v29, %v642_v25 }
 0x230   : > { %v814_v32 = vmax.f32 %v772_v28, 0.0 }
 0x231   : > { %v815_v34 = vmax.f32 %v774_v30, 0.0  ;;  %v777_v35 = vpop.f32.mrb[4].mxu1 }
 0x232   : > { %v1161_v36 = vpack.c.bf16 %v814_v32, %v812_v31  ;;  %v779_v37 = vpop.f32.mrb[5].mxu1  ;;  %v778_v11 = vadd.f32 %v777_v35, %v647_v38 }
 0x233   : > { %v1159_v39 = vpack.c.bf16 %v815_v34, %v813_v33  ;;  %v780_v41 = vadd.f32 %v779_v37, %v647_v38 }
 0x234   : > { %v816_v46 = vmax.f32 %v778_v11, 0.0 }
 0x235   : > { %v783_v42 = vpop.f32.mrb[6].mxu1  ;;  %1160 = vmatprep.subr.bf16.mxu1 %v1159_v39  ;;  %v817_v48 = vmax.f32 %v780_v41, 0.0 }
 0x236   : > { %v784_v43 = vadd.f32 %v783_v42, %v652_v40  ;;  %v785_v44 = vpop.f32.mrb[7].mxu1  ;;  %1162 = vmatpush1.bf16.msra.mxu1 %v1161_v36 }
 0x237   : > { %v786_v45 = vadd.f32 %v785_v44, %v652_v40 }
 0x238   : > { %v818_v47 = vmax.f32 %v784_v43, 0.0 }
 0x239   : > { %v819_v49 = vmax.f32 %v786_v45, 0.0  ;;  %v789_v50 = vpop.f32.mrb[8].mxu1 }
 0x23a   : > { %v1165_v51 = vpack.c.bf16 %v818_v47, %v816_v46  ;;  %v791_v52 = vpop.f32.mrb[9].mxu1  ;;  %v790_v55 = vadd.f32 %v789_v50, %v657_v53 }
 0x23b   : > { %v1163_v54 = vpack.c.bf16 %v819_v49, %v817_v48  ;;  %v792_v57 = vadd.f32 %v791_v52, %v657_v53 }
 0x23c   : > { %v820_v62 = vmax.f32 %v790_v55, 0.0 }
 0x23d   : > { %v795_v58 = vpop.f32.mrb[10].mxu1  ;;  %1164 = vmatprep.subr.bf16.mxu1 %v1163_v54  ;;  %v821_v1 = vmax.f32 %v792_v57, 0.0 }
 0x23e   : > { %v796_v59 = vadd.f32 %v795_v58, %v662_v56  ;;  %v797_v60 = vpop.f32.mrb[11].mxu1  ;;  %1166 = vmatpush1.bf16.msra.mxu1 %v1165_v51 }
 0x23f   : > { %v798_v61 = vadd.f32 %v797_v60, %v662_v56 }
 0x240   : > { %v822_v63 = vmax.f32 %v796_v59, 0.0 }
 0x241   : > { %v823_v2 = vmax.f32 %v798_v61, 0.0  ;;  %v801_v3 = vpop.f32.mrb[12].mxu1 }
 0x242   : > { %v1169_v4 = vpack.c.bf16 %v822_v63, %v820_v62  ;;  %v803_v5 = vpop.f32.mrb[13].mxu1  ;;  %v802_v0 = vadd.f32 %v801_v3, %v667_v7 }
 0x243   : > { %v1167_v6 = vpack.c.bf16 %v823_v2, %v821_v1  ;;  %v804_v9 = vadd.f32 %v803_v5, %v667_v7 }
 0x244   : > { %v824_v15 = vmax.f32 %v802_v0, 0.0 }
 0x245   : > { %v807_v10 = vpop.f32.mrb[14].mxu1  ;;  %1168 = vmatprep.subr.bf16.mxu1 %v1167_v6  ;;  %v825_v17 = vmax.f32 %v804_v9, 0.0 }
 0x246   : > { %v808_v12 = vadd.f32 %v807_v10, %v672_v8  ;;  %v809_v13 = vpop.f32.mrb[15].mxu1  ;;  %1170 = vmatpush1.bf16.msra.mxu1 %v1169_v4 }
 0x247   : > { %v810_v14 = vadd.f32 %v809_v13, %v672_v8 }
 0x248   : > { %v826_v16 = vmax.f32 %v808_v12, 0.0 }
 0x249   : > { %v827_v18 = vmax.f32 %v810_v14, 0.0 }
 0x24a   : > { %v1173_v19 = vpack.c.bf16 %v826_v16, %v824_v15 }
 0x24b   : > { %v1171_v20 = vpack.c.bf16 %v827_v18, %v825_v17 }
 0x24d   : > { %1172 = vmatprep.subr.bf16.mxu1 %v1171_v20 }
 0x24e   : > { %1174 = vmatpush1.bf16.msra.mxu1 %v1173_v19 }
 0x251   : > { %1040 = vmatmul.mubr.msk.f32.vlgmr.msra.gmra.mrb[16].mxu1 %vm674_vm2, %v828_v21 }
 0x324   : > { %v904_v23 = vpop.f32.mrb[16].mxu1 }
 0x325   : > { %v905_v24 = vadd.f32 %v904_v23, %v833_v22  ;;  %v906_v25 = vpop.f32.mrb[17].mxu1 }
 0x326   : > { %v907_v26 = vadd.f32 %v906_v25, %v833_v22 }
 0x327   : > { %909 = vst [vmem:[%s272_s20] sm:$0xff] %v905_v24 }
 0x328   : > { %910 = vst [vmem:[%s272_s20 + $0x8] sm:$0xff] %v907_v26 }
 0x329   : > { %1231 = shalt.err (!%p1228_p3)
}
 0x32a   : > { %s1232_s16 = scalar_lea.hbm %s1594_s29, 256  ;;  %s1236_s18 = scalar_lea.hbm %s1643_s7, 512 }
 0x32b   : > { %p1233_p4 = scmp.ne.s32.totalorder %s1594_s29, %s1232_s16  ;;  %p1237_p9 = scmp.lt.u32.totalorder %s1594_s29, %s1643_s7 }
 0x32c   : > { %p1238_p10 = scmp.lt.u32.totalorder %s1236_s18, %s1232_s16  ;;  %p1240_p12 = scmp.lt.u32.totalorder %s1232_s16, %s1594_s29 }
 0x32d   : > { %p1234_p7 = pnand %p1233_p4, %p1363_p5 }
 0x32e   : > { %p1239_p11 = por %p1238_p10, %p1237_p9 }
 0x32f   : > { %p1235_p8 = pneg %p1234_p7 }
 0x330   : > { %p1241_p13 = por %p1240_p12, %p1239_p11 }
 0x332   : > { %p1242_p0 = pnand %p1241_p13, %p1235_p8 }
 0x334   : > { %1245 = shalt.err (!%p1242_p0)
}
 0x335   : > { %1175 = dma.vmem_to_hbm [thread:$0]  (%p1363_p5), %s1596_s21, 256, %s1594_s29, %s912_s28  }
 0x336 PF: > { %p1181_p1 = scmp.ge.s32.totalorder %s1280_s27, 2  ;;  %s938_s22 = sand.u32 1, %s1268_s24  }
 0x337   : > { %s939_s23 = scalar_lea.sflag [#allocation3], %s938_s22 }
 0x338   : > { %p1178_p2 = pnand %p1181_p1, %p1367_p6 }
 0x33a   : > { %1263 = dma.done.wait (!%p1178_p2), %s939_s23, 256  }
 0x33b   : > { %1265 = vsyncadd (!%p1178_p2), %s939_s23, 4294967040  ;;  %p17_p3 = scmp.ge.s32.totalorder %s1350_s30, 4   ;;  %s1648_s24 = smov %s1272_s25 }
 0x33c   : > { %s1649_s25 = smov %s1276_s26  ;;  %s1650_s26 = smov %s1361_s10 }
 0x33d   : > { %s1651_s27 = smov %s1350_s30  ;;  %19 = sbr.rel (!%p17_p3) target bundleno = 3 (0x3), region = 83 }
 0x344   :  { %944 = vsyncpa [#allocation3], 1 }
 0x345   :  { %946 = vsyncpa [#allocation3 + $0x1], 1 }

</bundles_post_ra>
